<compile_context>
chip_gen: v5e
topology: v5e:2x2
jax: 0.10.0
libtpu: 0.0.40
codegen_flags: <defaults>
</compile_context>

<pallas_src>
import numpy as np
import jax
import jax.numpy as jnp
from jax.experimental import pallas as pl
from jax.experimental.pallas import tpu as pltpu

LANE = 128


def _round_up(x, m):
    return ((x + m - 1) // m) * m


# ---------------------------------------------------------------------------
# Kernel
# ---------------------------------------------------------------------------
def fwd_dyn_kernel(s_ref, a_ref, w1s_ref, w1a_ref, b1_ref, w2_ref, b2_ref,
                   w3_ref, b3_ref, o_ref):
    cdt = w2_ref.dtype  # compute dtype (bf16)
    s = s_ref[...].astype(cdt)
    a = a_ref[...].astype(cdt)

    # Layer 1: fused concat -> Linear -> ReLU (two MXU dots, f32 accumulate,
    # bias+ReLU+re-cast fused so only the bf16 intermediate is materialized).
    h1 = jnp.maximum(
        jnp.dot(s, w1s_ref[...], preferred_element_type=jnp.float32)
        + jnp.dot(a, w1a_ref[...], preferred_element_type=jnp.float32)
        + b1_ref[...],
        0.0).astype(cdt)

    # Layer 2: Linear -> ReLU.
    h2 = jnp.maximum(
        jnp.dot(h1, w2_ref[...], preferred_element_type=jnp.float32)
        + b2_ref[...],
        0.0).astype(cdt)

    # Layer 3: Linear -> Tanh (EUP), stored at the real output width.
    out = jnp.dot(h2, w3_ref[...], preferred_element_type=jnp.float32) \
        + b3_ref[...]
    o_ref[...] = jnp.tanh(out).astype(o_ref.dtype)


# ---------------------------------------------------------------------------
# Wrapper
# ---------------------------------------------------------------------------
def fwd_dyn(state, action, prep, *, tm=2048):
    """Pallas forward pass of FwdDyn.

    state:  [B, state_dim]  float32
    action: [B, action_dim] float32
    prep:   output of prepare_params() (bf16 weights, hidden lane-padded).
    """
    B, state_dim = state.shape
    action_dim = action.shape[1]
    num_outputs = prep["num_outputs"]
    h_pad = prep["w2"].shape[0]

    # Batch tile: multiple of 8 (f32 sublane packing); tail block is partial
    # and masked by Pallas -- no batch padding, no output slice.
    tm_eff = min(tm, _round_up(B, 8))
    grid = (pl.cdiv(B, tm_eff),)

    weights = (prep["w1_s"], prep["w1_a"], prep["b1"], prep["w2"], prep["b2"],
               prep["w3"], prep["b3"])

    def resident(arr):  # whole-array block, constant index -> stays in VMEM
        return pl.BlockSpec(arr.shape, lambda i: (0,) * arr.ndim)

    flops = 2 * B * (state_dim * h_pad + action_dim * h_pad
                     + h_pad * h_pad + h_pad * num_outputs)
    bytes_accessed = (state.size * state.dtype.itemsize
                      + action.size * action.dtype.itemsize
                      + sum(int(w.size) * w.dtype.itemsize for w in weights)
                      + B * num_outputs * 4)

    out = pl.pallas_call(
        fwd_dyn_kernel,
        out_shape=jax.ShapeDtypeStruct((B, num_outputs), jnp.float32),
        grid=grid,
        in_specs=[pl.BlockSpec((tm_eff, state_dim), lambda i: (i, 0)),
                  pl.BlockSpec((tm_eff, action_dim), lambda i: (i, 0))]
                 + [resident(w) for w in weights],
        out_specs=pl.BlockSpec((tm_eff, num_outputs), lambda i: (i, 0)),
        compiler_params=pltpu.CompilerParams(
            dimension_semantics=("parallel",)),
        cost_estimate=pl.CostEstimate(
            flops=flops,
            transcendentals=B * num_outputs,
            bytes_accessed=bytes_accessed),
    )(state, action, *weights)

    return out


# ---------------------------------------------------------------------------
# Parameter construction / preparation
# ---------------------------------------------------------------------------
def _orthogonal(key, shape, gain):
    """Deterministic orthogonal init (mirrors nn.init.orthogonal_)."""
    rows, cols = shape
    a = jax.random.normal(key, (max(rows, cols), min(rows, cols)), jnp.float32)
    q, r = jnp.linalg.qr(a)
    q = q * jnp.sign(jnp.diag(r))
    if rows < cols:
        q = q.T
    return gain * q[:rows, :cols]


def make_params(num_inputs, hidden_size, num_outputs, seed=0):
    """f32 params, weights stored [in, out] (transposed vs torch's [out, in])."""
    keys = jax.random.split(jax.random.PRNGKey(seed), 3)
    relu_gain = float(np.sqrt(2.0))   # init_relu -> orthogonal(gain=sqrt(2)), bias 0
    tanh_gain = 1.0                   # init_tanh -> orthogonal(gain=1), bias 0
    return {
        "w1": _orthogonal(keys[0], (num_inputs, hidden_size), relu_gain),
        "b1": jnp.zeros((1, hidden_size), jnp.float32),
        "w2": _orthogonal(keys[1], (hidden_size, hidden_size), relu_gain),
        "b2": jnp.zeros((1, hidden_size), jnp.float32),
        "w3": _orthogonal(keys[2], (hidden_size, num_outputs), tanh_gain),
        "b3": jnp.zeros((1, num_outputs), jnp.float32),
    }


def prepare_params(params, state_dim, compute_dtype=jnp.bfloat16):
    """One-time prep: split W1 by (state, action) to fuse the concat, pad the
    hidden dim to 128 lanes (zero padding keeps results exact), cast weights
    to bf16.  Output dim is NOT padded -- stores go out at the real width."""
    w1, w2, w3 = params["w1"], params["w2"], params["w3"]
    hidden = w1.shape[1]
    num_outputs = w3.shape[1]
    h_pad = _round_up(hidden, LANE)

    def pad2(w, rows, cols):
        return jnp.pad(w, ((0, rows - w.shape[0]), (0, cols - w.shape[1])))

    def pad_bias(b, cols):
        b = b.reshape(1, -1)
        return jnp.pad(b, ((0, 0), (0, cols - b.shape[1]))).astype(jnp.float32)

    w1p = pad2(w1, w1.shape[0], h_pad).astype(compute_dtype)
    return {
        "w1_s": w1p[:state_dim],                             # [state_dim, h_pad]
        "w1_a": w1p[state_dim:],                             # [action_dim, h_pad]
        "b1": pad_bias(params["b1"], h_pad),                 # [1, h_pad] f32
        "w2": pad2(w2, h_pad, h_pad).astype(compute_dtype),  # [h_pad, h_pad]
        "b2": pad_bias(params["b2"], h_pad),                 # [1, h_pad] f32
        "w3": pad2(w3, h_pad, num_outputs).astype(compute_dtype),  # [h_pad, no]
        "b3": params["b3"].reshape(1, -1).astype(jnp.float32),     # [1, no] f32
        "num_outputs": num_outputs,
    }


def fwd_dyn_ref(state, action, params):
    """Pure-JAX f32 reference for correctness check."""
    x = jnp.concatenate([state, action], axis=-1)
    h = jax.nn.relu(x @ params["w1"] + params["b1"])
    h = jax.nn.relu(h @ params["w2"] + params["b2"])
    return jnp.tanh(h @ params["w3"] + params["b3"])


# ---------------------------------------------------------------------------
# Self-test
# ---------------------------------------------------------------------------
if __name__ == "__main__":
    state_dim, action_dim = 24, 8
    num_inputs = state_dim + action_dim    # 32
    hidden_size = 32
    num_outputs = 16

    params = make_params(num_inputs, hidden_size, num_outputs, seed=0)
    prep = prepare_params(params, state_dim)

    key = jax.random.PRNGKey(0)

    # Case 1: small batch (grid = 1).
    k_s, k_a, key = jax.random.split(key, 3)
    state = jax.random.normal(k_s, (8, state_dim), jnp.float32)
    action = jax.random.normal(k_a, (8, action_dim), jnp.float32)
    out = jax.block_until_ready(fwd_dyn(state, action, prep))
    ref = fwd_dyn_ref(state, action, params)
    np.testing.assert_allclose(np.asarray(out), np.asarray(ref),
                               rtol=5e-2, atol=5e-2)

    # Case 2: larger, non-multiple batch exercising grid > 1 and a partial
    # (masked) tail block.
    k_s, k_a, key = jax.random.split(key, 3)
    state = jax.random.normal(k_s, (300, state_dim), jnp.float32)
    action = jax.random.normal(k_a, (300, action_dim), jnp.float32)
    out = jax.block_until_ready(fwd_dyn(state, action, prep, tm=128))
    ref = fwd_dyn_ref(state, action, params)
    np.testing.assert_allclose(np.asarray(out), np.asarray(ref),
                               rtol=5e-2, atol=5e-2)

    # Case 3: default large tile path (grid = 1, tm capped at round_up(B, 8)).
    k_s, k_a, key = jax.random.split(key, 3)
    state = jax.random.normal(k_s, (300, state_dim), jnp.float32)
    action = jax.random.normal(k_a, (300, action_dim), jnp.float32)
    out = jax.block_until_ready(fwd_dyn(state, action, prep))
    ref = fwd_dyn_ref(state, action, params)
    np.testing.assert_allclose(np.asarray(out), np.asarray(ref),
                               rtol=5e-2, atol=5e-2)

    print("KERNEL_OK")
</pallas_src>

<mosaic_0001>
module attributes {stable_mosaic.version = 11 : i64} {
  func.func @fwd_dyn_kernel(%arg0: i32, %arg1: memref<8x24xf32, #tpu.memory_space<vmem>>, %arg2: memref<8x8xf32, #tpu.memory_space<vmem>>, %arg3: memref<24x128xbf16, #tpu.memory_space<vmem>>, %arg4: memref<8x128xbf16, #tpu.memory_space<vmem>>, %arg5: memref<1x128xf32, #tpu.memory_space<vmem>>, %arg6: memref<128x128xbf16, #tpu.memory_space<vmem>>, %arg7: memref<1x128xf32, #tpu.memory_space<vmem>>, %arg8: memref<128x16xbf16, #tpu.memory_space<vmem>>, %arg9: memref<1x16xf32, #tpu.memory_space<vmem>>, %arg10: memref<8x16xf32, #tpu.memory_space<vmem>>) attributes {dimension_semantics = [#tpu.dimension_semantics<parallel>], iteration_bounds = array<i64: 1>, scalar_prefetch = 0 : i64, scratch_operands = 0 : i64, tpu.core_type = #tpu.core_type<tc>, window_params = [{transform_indices = @transform_0, window_bounds = array<i64: 8, 24>}, {transform_indices = @transform_1, window_bounds = array<i64: 8, 8>}, {pipeline_mode = #tpu.pipeline_mode<synchronous>, transform_indices = @transform_2, window_bounds = array<i64: 24, 128>}, {pipeline_mode = #tpu.pipeline_mode<synchronous>, transform_indices = @transform_3, window_bounds = array<i64: 8, 128>}, {pipeline_mode = #tpu.pipeline_mode<synchronous>, transform_indices = @transform_4, window_bounds = array<i64: 1, 128>}, {pipeline_mode = #tpu.pipeline_mode<synchronous>, transform_indices = @transform_5, window_bounds = array<i64: 128, 128>}, {pipeline_mode = #tpu.pipeline_mode<synchronous>, transform_indices = @transform_6, window_bounds = array<i64: 1, 128>}, {pipeline_mode = #tpu.pipeline_mode<synchronous>, transform_indices = @transform_7, window_bounds = array<i64: 128, 16>}, {pipeline_mode = #tpu.pipeline_mode<synchronous>, transform_indices = @transform_8, window_bounds = array<i64: 1, 16>}, {transform_indices = @transform_9, window_bounds = array<i64: 8, 16>}]} {
    %c0 = arith.constant 0 : index
    %c0_0 = arith.constant 0 : index
    %0 = vector.load %arg1[%c0, %c0_0] : memref<8x24xf32, #tpu.memory_space<vmem>>, vector<8x24xf32>
    %1 = arith.truncf %0 : vector<8x24xf32> to vector<8x24xbf16>
    %c0_1 = arith.constant 0 : index
    %c0_2 = arith.constant 0 : index
    %2 = vector.load %arg2[%c0_1, %c0_2] : memref<8x8xf32, #tpu.memory_space<vmem>>, vector<8x8xf32>
    %3 = arith.truncf %2 : vector<8x8xf32> to vector<8x8xbf16>
    %c0_3 = arith.constant 0 : index
    %c0_4 = arith.constant 0 : index
    %4 = vector.load %arg3[%c0_3, %c0_4] : memref<24x128xbf16, #tpu.memory_space<vmem>>, vector<24x128xbf16>
    %cst = arith.constant dense<0.000000e+00> : vector<8x128xf32>
    %5 = tpu.matmul %1, %4, %cst {dimension_numbers = #tpu.dot_dimension_numbers<[1], [0], [0], [1], [0, 0, 1, 1], [], []>} : vector<8x24xbf16>, vector<24x128xbf16>, vector<8x128xf32> -> vector<8x128xf32>
    %c0_5 = arith.constant 0 : index
    %c0_6 = arith.constant 0 : index
    %6 = vector.load %arg4[%c0_5, %c0_6] : memref<8x128xbf16, #tpu.memory_space<vmem>>, vector<8x128xbf16>
    %cst_7 = arith.constant dense<0.000000e+00> : vector<8x128xf32>
    %7 = tpu.matmul %3, %6, %cst_7 {dimension_numbers = #tpu.dot_dimension_numbers<[1], [0], [0], [1], [0, 0, 1, 1], [], []>} : vector<8x8xbf16>, vector<8x128xbf16>, vector<8x128xf32> -> vector<8x128xf32>
    %8 = arith.addf %5, %7 : vector<8x128xf32>
    %c0_8 = arith.constant 0 : index
    %c0_9 = arith.constant 0 : index
    %9 = vector.load %arg5[%c0_8, %c0_9] : memref<1x128xf32, #tpu.memory_space<vmem>>, vector<1x128xf32>
    %10 = vector.broadcast %9 : vector<1x128xf32> to vector<8x128xf32>
    %11 = arith.addf %8, %10 : vector<8x128xf32>
    %cst_10 = arith.constant 0.000000e+00 : f32
    %12 = vector.broadcast %cst_10 : f32 to vector<8x128xf32>
    %13 = arith.maximumf %11, %12 : vector<8x128xf32>
    %14 = arith.truncf %13 : vector<8x128xf32> to vector<8x128xbf16>
    %c0_11 = arith.constant 0 : index
    %c0_12 = arith.constant 0 : index
    %15 = vector.load %arg6[%c0_11, %c0_12] : memref<128x128xbf16, #tpu.memory_space<vmem>>, vector<128x128xbf16>
    %cst_13 = arith.constant dense<0.000000e+00> : vector<8x128xf32>
    %16 = tpu.matmul %14, %15, %cst_13 {dimension_numbers = #tpu.dot_dimension_numbers<[1], [0], [0], [1], [0, 0, 1, 1], [], []>} : vector<8x128xbf16>, vector<128x128xbf16>, vector<8x128xf32> -> vector<8x128xf32>
    %c0_14 = arith.constant 0 : index
    %c0_15 = arith.constant 0 : index
    %17 = vector.load %arg7[%c0_14, %c0_15] : memref<1x128xf32, #tpu.memory_space<vmem>>, vector<1x128xf32>
    %18 = vector.broadcast %17 : vector<1x128xf32> to vector<8x128xf32>
    %19 = arith.addf %16, %18 : vector<8x128xf32>
    %cst_16 = arith.constant 0.000000e+00 : f32
    %20 = vector.broadcast %cst_16 : f32 to vector<8x128xf32>
    %21 = arith.maximumf %19, %20 : vector<8x128xf32>
    %22 = arith.truncf %21 : vector<8x128xf32> to vector<8x128xbf16>
    %c0_17 = arith.constant 0 : index
    %c0_18 = arith.constant 0 : index
    %23 = vector.load %arg8[%c0_17, %c0_18] : memref<128x16xbf16, #tpu.memory_space<vmem>>, vector<128x16xbf16>
    %cst_19 = arith.constant dense<0.000000e+00> : vector<8x16xf32>
    %24 = tpu.matmul %22, %23, %cst_19 {dimension_numbers = #tpu.dot_dimension_numbers<[1], [0], [0], [1], [0, 0, 1, 1], [], []>} : vector<8x128xbf16>, vector<128x16xbf16>, vector<8x16xf32> -> vector<8x16xf32>
    %c0_20 = arith.constant 0 : index
    %c0_21 = arith.constant 0 : index
    %25 = vector.load %arg9[%c0_20, %c0_21] : memref<1x16xf32, #tpu.memory_space<vmem>>, vector<1x16xf32>
    %26 = vector.broadcast %25 : vector<1x16xf32> to vector<8x16xf32>
    %27 = arith.addf %24, %26 : vector<8x16xf32>
    %28 = math.tanh %27 : vector<8x16xf32>
    %c0_22 = arith.constant 0 : index
    %c0_23 = arith.constant 0 : index
    %29 = vector.load %arg10[%c0_22, %c0_23] : memref<8x16xf32, #tpu.memory_space<vmem>>, vector<8x16xf32>
    tpu.vector_store %arg10[%c0_22, %c0_23], %28 {strides = array<i32>} : memref<8x16xf32, #tpu.memory_space<vmem>>, vector<8x16xf32>,
    return
  }
  func.func @transform_0(%arg0: i32) -> (i32, i32) {
    %c0_i32 = arith.constant 0 : i32
    %c0_i32_0 = arith.constant 0 : i32
    return %arg0, %c0_i32 : i32, i32
  }
  func.func @transform_1(%arg0: i32) -> (i32, i32) {
    %c0_i32 = arith.constant 0 : i32
    %c0_i32_0 = arith.constant 0 : i32
    return %arg0, %c0_i32 : i32, i32
  }
  func.func @transform_2(%arg0: i32) -> (i32, i32) {
    %c0_i32 = arith.constant 0 : i32
    %c0_i32_0 = arith.constant 0 : i32
    %c0_i32_1 = arith.constant 0 : i32
    return %c0_i32, %c0_i32_0 : i32, i32
  }
  func.func @transform_3(%arg0: i32) -> (i32, i32) {
    %c0_i32 = arith.constant 0 : i32
    %c0_i32_0 = arith.constant 0 : i32
    %c0_i32_1 = arith.constant 0 : i32
    return %c0_i32, %c0_i32_0 : i32, i32
  }
  func.func @transform_4(%arg0: i32) -> (i32, i32) {
    %c0_i32 = arith.constant 0 : i32
    %c0_i32_0 = arith.constant 0 : i32
    %c0_i32_1 = arith.constant 0 : i32
    return %c0_i32, %c0_i32_0 : i32, i32
  }
  func.func @transform_5(%arg0: i32) -> (i32, i32) {
    %c0_i32 = arith.constant 0 : i32
    %c0_i32_0 = arith.constant 0 : i32
    %c0_i32_1 = arith.constant 0 : i32
    return %c0_i32, %c0_i32_0 : i32, i32
  }
  func.func @transform_6(%arg0: i32) -> (i32, i32) {
    %c0_i32 = arith.constant 0 : i32
    %c0_i32_0 = arith.constant 0 : i32
    %c0_i32_1 = arith.constant 0 : i32
    return %c0_i32, %c0_i32_0 : i32, i32
  }
  func.func @transform_7(%arg0: i32) -> (i32, i32) {
    %c0_i32 = arith.constant 0 : i32
    %c0_i32_0 = arith.constant 0 : i32
    %c0_i32_1 = arith.constant 0 : i32
    return %c0_i32, %c0_i32_0 : i32, i32
  }
  func.func @transform_8(%arg0: i32) -> (i32, i32) {
    %c0_i32 = arith.constant 0 : i32
    %c0_i32_0 = arith.constant 0 : i32
    %c0_i32_1 = arith.constant 0 : i32
    return %c0_i32, %c0_i32_0 : i32, i32
  }
  func.func @transform_9(%arg0: i32) -> (i32, i32) {
    %c0_i32 = arith.constant 0 : i32
    %c0_i32_0 = arith.constant 0 : i32
    return %arg0, %c0_i32 : i32, i32
  }
}

</mosaic_0001>

<bundles_post_ra>
// kernel: tpu_custom_call.1
= control target key start
LH: loop header
LB: loop body
LE: loop exit
PB: predicated region body
PF: predicated region fallthrough
CT: control target
= control target key end

     0   :  { %14 = vsyncpa [#allocation3], 0  ;;  %s695_s0 = inlined_call_operand.hbm [shape: f32[8,24], index: 0, kind: input, shape index: {}]   ;;  %s696_s1 = inlined_call_operand.hbm [shape: f32[8,8], index: 1, kind: input, shape index: {}]   ;;  %s697_s2 = inlined_call_operand.vmem [shape: bf16[24,128], index: 2, kind: input, shape index: {}]   ;;  %s698_s3 = inlined_call_operand.hbm [shape: bf16[8,128], index: 3, kind: input, shape index: {}]   ;;  %s699_s4 = inlined_call_operand.hbm [shape: f32[1,128], index: 4, kind: input, shape index: {}]   ;;  %s700_s5 = inlined_call_operand.vmem [shape: bf16[128,128], index: 5, kind: input, shape index: {}]   ;;  %s701_s6 = inlined_call_operand.vmem [shape: f32[1,128], index: 6, kind: input, shape index: {}]   ;;  %s702_s7 = inlined_call_operand.vmem [shape: bf16[128,16], index: 7, kind: input, shape index: {}]   ;;  %s703_s8 = inlined_call_operand.vmem [shape: f32[1,16], index: 8, kind: input, shape index: {}]   ;;  %s704_s9 = inlined_call_operand.hbm [shape: f32[8,16], index: 9, kind: output, shape index: {}]  }
   0x1   :  { %15 = vsyncpa [#allocation6], 0 }
   0x2   :  { %16 = vsyncpa [#allocation9], 0  ;;  %s34_s11 = sshll.u32 %s696_s1, 4  ;;  %s35_s11 = int_to_ptr.hbm [resolvable:$true] %s34_s11 }
   0x3   :  { %17 = vsyncpa [#allocation4], 0  ;;  %s565_s12 = smov [#allocation5]   ;;  %s23_s16 = sshll.u32 %s695_s0, 4  ;;  %s24_s16 = int_to_ptr.hbm [resolvable:$true] %s23_s16 }
   0x4   :  { %s36_s13 = sshll.u32 %s565_s12, 4  ;;  %s566_s17 = smov [#allocation2]   ;;  %s37_s13 = int_to_ptr.vmem [resolvable:$true] %s36_s13 }
   0x5   :  { %39 = dma.hbm_to_vmem [thread:$0]  %s35_s11, 128, %s37_s13, [#allocation6]  }
   0x6   :  { %s25_s18 = sshll.u32 %s566_s17, 4  ;;  %s47_s21 = sshll.u32 %s698_s3, 4  ;;  %s26_s18 = int_to_ptr.vmem [resolvable:$true] %s25_s18  ;;  %s48_s21 = int_to_ptr.hbm [resolvable:$true] %s47_s21 }
   0x7   :  { %28 = dma.hbm_to_vmem [thread:$0]  %s24_s16, 128, %s26_s18, [#allocation3]  }
   0x8   :  { %s58_s23 = sshll.u32 %s699_s4, 4  ;;  %s567_s24 = smov [#allocation7]   ;;  %s59_s23 = int_to_ptr.hbm [resolvable:$true] %s58_s23 }
   0x9   :  { %s49_s25 = sshll.u32 %s567_s24, 4  ;;  %s568_s0 = smov [#allocation8]   ;;  %s50_s25 = int_to_ptr.vmem [resolvable:$true] %s49_s25 }
   0xa   :  { %52 = dma.hbm_to_vmem [thread:$0]  %s48_s21, 64, %s50_s25, [#allocation6]  }
   0xb   :  { %s60_s26 = sshll.u32 %s568_s0, 4  ;;  %s61_s26 = int_to_ptr.vmem [resolvable:$true] %s60_s26 }
   0xc   :  { %63 = dma.hbm_to_vmem [thread:$0]  %s59_s23, 16, %s61_s26, [#allocation9]  }
   0xd   :  { %557 = dma.done.wait [#allocation3], 128  }
   0xe   :  { %558 = vsyncadd [#allocation3], 4294967168 }
   0xf   :  { %559 = dma.done.wait [#allocation6], 192  }
  0x10   :  { %560 = vsyncadd [#allocation6], 4294967104 }
  0x11   :  { %561 = dma.done.wait [#allocation9], 16  }
  0x12   :  { %562 = vsyncadd [#allocation9], 4294967280  ;;  %vm101_vm0 = vcmask 1043456   ;;  %v96_v0 = vld [vmem:[#allocation7] sm:$0xf]  ;;  %v91_v1 = vld [vmem:[#allocation5] sm:$0xff] }
  0x13   :  { %v95_v2 = vld [vmem:[%s697_s2 + $0x8] sm:$0xf]  ;;  %v103_v3 = vsel %vm101_vm0, %v96_v0, 0  ;;  %v92_v4 = vpack.c.bf16 %v91_v1, %v91_v1  ;;  %v418_v6 = vld [vmem:[%s700_s5 + $0x38] sm:$0xff]  ;;  %vm97_vm1 = vcmask 64512   ;;  %v417_v7 = vld [vmem:[%s700_s5 + $0x30] sm:$0xff] }
  0x14   :  { %v123_v5 = vunpack.c.l.b16 %v95_v2  ;;  %112 = vmatpush.bf16.msra.mxu0 %v103_v3  ;;  %222 = vmatpush.bf16.msra.mxu2 %v418_v6  ;;  %v410_v10 = vld [vmem:[%s697_s2] sm:$0xff]  ;;  %v416_v12 = vld [vmem:[%s700_s5 + $0x28] sm:$0xff]  ;;  %vm127_vm2 = vcmask 195584   ;;  %v414_v15 = vld [vmem:[%s700_s5 + $0x18] sm:$0xff]  ;;  %s569_s17 = smov [#allocation10]   ;;  %s328_s19 = sshll.u32 %s704_s9, 4  ;;  %s329_s19 = int_to_ptr.hbm [resolvable:$true] %s328_s19 }
  0x15   :  { %v89_v11 = vld [vmem:[#allocation2] sm:$0xff]  ;;  %v413_v16 = vld [vmem:[%s700_s5 + $0x10] sm:$0xff]  ;;  %v412_v17 = vld [vmem:[%s700_s5 + $0x8] sm:$0xff]  ;;  %vm319_vm3 = vcmask 130048  }
  0x16   :  { %v125_v8 = vpack.c.b16 %v123_v5, %v123_v5  ;;  %v90_v13 = vpack.c.bf16 %v89_v11, %v89_v11  ;;  %v415_v14 = vld [vmem:[%s700_s5 + $0x20] sm:$0xff]  ;;  %v426_v19 = vld [vmem:[%s702_s7 + $0x38] sm:$0xff]  ;;  %v425_v20 = vld [vmem:[%s702_s7 + $0x30] sm:$0xff] }
  0x17   :  { %340 = vmatmul.msk.bf16.vlgmr.msra.gmra.mxu0 %vm97_vm1, %v92_v4  ;;  %v411_v18 = vld [vmem:[%s700_s5] sm:$0xff]  ;;  %305 = vmatpush.bf16.msra.mxu3 %v426_v19  ;;  %v424_v21 = vld [vmem:[%s702_s7 + $0x28] sm:$0xff]  ;;  %v422_v23 = vld [vmem:[%s702_s7 + $0x18] sm:$0xff] }
  0x18   :  { %v132_v9 = vsel %vm101_vm0, %v125_v8, 0  ;;  %223 = vmatpush.bf16.msra.mxu2 %v417_v7  ;;  %v423_v22 = vld [vmem:[%s702_s7 + $0x20] sm:$0xff]  ;;  %v421_v25 = vld [vmem:[%s702_s7 + $0x10] sm:$0xff]  ;;  %v420_v34 = vld [vmem:[%s702_s7 + $0x8] sm:$0xff] }
  0x19   :  { %140 = vmatpush.bf16.msra.mxu1 %v132_v9  ;;  %v432_v26 = vld [vmem:[#allocation8] ss:$0 sm:$0xff]  ;;  %v419_v35 = vld [vmem:[%s702_s7] sm:$0xff]  ;;  %s326_s7 = sshll.u32 %s569_s17, 4  ;;  %s327_s7 = int_to_ptr.vmem [resolvable:$true] %s326_s7 }
  0x1a   :  { %v433_v36 = vld [vmem:[%s701_s6] ss:$0 sm:$0xff] }
  0x1b   :  { %306 = vmatpush.bf16.msra.mxu3 %v425_v20  ;;  %v434_v42 = vld [vmem:[%s703_s8] ss:$0 sm:$0xff] }
  0x1c   :  { %224 = vmatpush.bf16.msra.mxu2 %v416_v12 }
  0x1d   :  { %141 = vmatpush.bf16.msra.mxu1 %v410_v10 }
  0x1f   :  { %307 = vmatpush.bf16.msra.mxu3 %v424_v21 }
  0x20   :  { %345 = vmatmul.msk.bf16.vlgmr.msra.gmra.mxu1 %vm127_vm2, %v90_v13  ;;  %225 = vmatpush.bf16.msra.mxu2 %v415_v14 }
  0x23   :  { %308 = vmatpush.bf16.msra.mxu3 %v423_v22 }
  0x24   :  { %226 = vmatpush.bf16.msra.mxu2 %v414_v15 }
  0x27   :  { %309 = vmatpush.bf16.msra.mxu3 %v422_v23 }
  0x28   :  { %227 = vmatpush.bf16.msra.mxu2 %v413_v16 }
  0x2b   :  { %310 = vmatpush.bf16.msra.mxu3 %v421_v25 }
  0x2c   :  { %228 = vmatpush.bf16.msra.mxu2 %v412_v17 }
  0x2f   :  { %311 = vmatpush.bf16.msra.mxu3 %v420_v34 }
  0x30   :  { %229 = vmatpush.bf16.msra.mxu2 %v411_v18 }
  0x33   :  { %312 = vmatpush.bf16.msra.mxu3 %v419_v35 }
  0x94   :  { %v114_v24 = vpop.f32.mrf.mxu0 }
  0x9c   :  { %v116_v27 = vpop.f32.mrf.mxu0 }
  0x9d   :  { %v143_v28 = vpop.f32.mrf.mxu1 }
  0x9e   :  { %v144_v29 = vadd.f32 %v143_v28, %v114_v24 }
  0xa0   :  { %v151_v30 = vadd.f32 %v432_v26, %v144_v29 }
  0xa2   :  { %v152_v31 = vmax.f32 %v151_v30, 0.0 }
  0xa4   :  { %v153_v32 = vpack.c.bf16 %v152_v31, %v152_v31 }
  0xa5   :  { %v145_v33 = vpop.f32.mrf.mxu1 }
  0xa6   :  { %230 = vmatmul.bf16.vlgmr.msra.gmra.mxu2 %v153_v32 }
 0x129   :  { %v231_v37 = vpop.f32.mrf.mxu2 }
 0x12a   :  { %v232_v38 = vadd.f32 %v433_v36, %v231_v37 }
 0x12c   :  { %v235_v39 = vmax.f32 %v232_v38, 0.0 }
 0x12e   :  { %v236_v40 = vpack.c.bf16 %v235_v39, %v235_v39 }
 0x130   :  { %313 = vmatmul.bf16.vlgmr.msra.gmra.mxu3 %v236_v40 }
 0x131   :  { %v233_v41 = vpop.f32.mrf.mxu2 }
 0x1b3   :  { %v314_v43 = vpop.f32.mrf.mxu3 }
 0x1b4   :  { %v315_v44 = vadd.f32 %v434_v42, %v314_v43 }
 0x1b6   :  { %435 = vtanh.f32 %v315_v44 }
 0x1bb   :  { %v316_v45 = vpop.f32.mrf.mxu3 }
 0x1bc   :  { %v436_v46 = vpop.eup %435 }
 0x1bd   :  { %320 = vst.msk [vmem:[#allocation10] sm:$0xff] %vm319_vm3, %v436_v46 }
 0x1be   :  { %331 = dma.vmem_to_hbm [thread:$0]  %s327_s7, 128, %s329_s19, [#allocation4]  }
 0x1bf   :  { %563 = dma.done.wait [#allocation4], 128  }
 0x1c0   :  { %564 = vsyncadd [#allocation4], 4294967168 }
 0x1c1   :  { %336 = vsyncpa [#allocation3], 1 }
 0x1c2   :  { %337 = vsyncpa [#allocation6], 1 }
 0x1c3   :  { %338 = vsyncpa [#allocation9], 1 }
 0x1c4   :  { %339 = vsyncpa [#allocation4], 1 }

</bundles_post_ra>
